<compile_context>
chip_gen: v7x
topology: tpu7x:2x2x1
jax: 0.10.0
libtpu: 0.0.40
codegen_flags: <defaults>
</compile_context>

<pallas_src>
import math

import jax
import jax.numpy as jnp
from jax.experimental import pallas as pl
from jax.experimental.pallas import tpu as pltpu


# ----------------------- chip-adaptive tiling defaults ------------------------
def _vmem_capacity_bytes():
    try:
        return pltpu.get_tpu_info().vmem_capacity_bytes
    except Exception:
        return 64 * 1024 * 1024            # conservative (v7x-sized) fallback


if _vmem_capacity_bytes() >= 100 * 1024 * 1024:
    # v5e / v6e: 128 MiB physical VMEM -> bigger matmul tiles, fewer grid steps.
    _LIN_TM, _LIN_TN, _LIN_TK = 512, 512, 1024
    _VMEM_LIMIT = 64 * 1024 * 1024
else:
    # v7x: 64 MiB physical (32 MiB scoped default) -> keep tiles conservative.
    _LIN_TM, _LIN_TN, _LIN_TK = 256, 256, 512
    _VMEM_LIMIT = 32 * 1024 * 1024


def _fit_tile(dim, target, granule):
    """Largest multiple of `granule` <= target that evenly divides `dim`.

    Walks a divisor ladder (target, target-granule, ...) instead of silently
    taking the whole dimension; falls back to the full dim only when no
    multiple of `granule` divides it (a full-extent block is the other shape
    Mosaic accepts)."""
    t = min(target, dim)
    t = (t // granule) * granule
    while t >= granule:
        if dim % t == 0:
            return t
        t -= granule
    return dim


# ----------------------------- Tiled linear kernel --------------------------
def _linear_kernel(x_ref, w_ref, b_ref, o_ref, acc_ref):
    @pl.when(pl.program_id(2) == 0)
    def _init():
        acc_ref[...] = jnp.zeros_like(acc_ref)

    acc_ref[...] += jnp.dot(x_ref[...], w_ref[...],
                            preferred_element_type=jnp.float32)

    @pl.when(pl.program_id(2) == pl.num_programs(2) - 1)
    def _finalize():
        o_ref[...] = (acc_ref[...]
                      + b_ref[...].astype(jnp.float32)).astype(o_ref.dtype)


def linear(x, w, b, *, tm=None, tn=None, tk=None):
    """y = x @ w + b with a K-accumulating, M/N-parallel grid."""
    M, K = x.shape
    N = w.shape[1]
    tm = _fit_tile(M, tm or _LIN_TM, 8)      # sublane dim of x / out blocks
    tn = _fit_tile(N, tn or _LIN_TN, 128)    # lane dim of w / out blocks
    tk = _fit_tile(K, tk or _LIN_TK, 128)    # lane dim of x, sublane dim of w
    grid = (M // tm, N // tn, K // tk)
    cost = pl.CostEstimate(
        flops=2 * M * N * K,
        transcendentals=0,
        bytes_accessed=(M * K + K * N + M * N) * x.dtype.itemsize,
    )
    return pl.pallas_call(
        _linear_kernel,
        out_shape=jax.ShapeDtypeStruct((M, N), x.dtype),
        grid_spec=pltpu.PrefetchScalarGridSpec(
            num_scalar_prefetch=0,
            grid=grid,
            in_specs=[
                pl.BlockSpec((tm, tk), lambda i, j, k: (i, k)),
                pl.BlockSpec((tk, tn), lambda i, j, k: (k, j)),
                pl.BlockSpec((1, tn), lambda i, j, k: (0, j)),
            ],
            out_specs=pl.BlockSpec((tm, tn), lambda i, j, k: (i, j)),
            scratch_shapes=[pltpu.VMEM((tm, tn), jnp.float32)],
        ),
        compiler_params=pltpu.CompilerParams(
            dimension_semantics=("parallel", "parallel", "arbitrary"),
            vmem_limit_bytes=_VMEM_LIMIT,
        ),
        cost_estimate=cost,
    )(x, w, b.reshape(1, N))


# ---------------------- Flash-style attention (default path) ----------------
def _make_flash_attn_kernel(h, d_k, with_bias):
    """Online-softmax attention over a K/V-tiled grid axis.

    Note: 1/sqrt(d_k) is pre-folded into the Q projection weights
    (prepare_params), so no score scaling happens here."""

    def kernel(*refs):
        if with_bias:
            q_ref, k_ref, v_ref, bias_ref, o_ref, m_sc, l_sc, acc_sc = refs
        else:
            q_ref, k_ref, v_ref, o_ref, m_sc, l_sc, acc_sc = refs
            bias_ref = None

        kv = pl.program_id(2)

        @pl.when(kv == 0)
        def _init():
            m_sc[...] = jnp.full_like(m_sc, -jnp.inf)
            l_sc[...] = jnp.zeros_like(l_sc)
            acc_sc[...] = jnp.zeros_like(acc_sc)

        bias = bias_ref[0] if with_bias else None          # [1, tk] f32

        for head in range(h):                              # static unroll
            lo, hi = head * d_k, (head + 1) * d_k
            q = q_ref[0, :, lo:hi]                         # [tq, d_k]
            k = k_ref[0, :, lo:hi]                         # [tk, d_k]
            v = v_ref[0, :, lo:hi]                         # [tk, d_k]
            # scores = q @ k^T with f32 MXU accumulation (scale folded into q).
            s = jax.lax.dot_general(
                q, k, (((1,), (1,)), ((), ())),
                preferred_element_type=jnp.float32)        # [tq, tk]
            if with_bias:
                s = s + bias
            m_prev = m_sc[head]                            # [tq, 1]
            m_new = jnp.maximum(m_prev, jnp.max(s, axis=-1, keepdims=True))
            alpha = jnp.exp(m_prev - m_new)                # [tq, 1]
            p = jnp.exp(s - m_new)                         # [tq, tk]
            l_sc[head] = alpha * l_sc[head] + jnp.sum(p, axis=-1, keepdims=True)
            pv = jnp.dot(p.astype(v.dtype), v,
                         preferred_element_type=jnp.float32)   # [tq, d_k]
            acc_sc[head] = alpha * acc_sc[head] + pv
            m_sc[head] = m_new

        @pl.when(kv == pl.num_programs(2) - 1)
        def _finalize():
            # Normalize the [tq, d_k] accumulators (not the [tq, S] probs).
            outs = []
            for head in range(h):
                inv_l = pl.reciprocal(l_sc[head], approx=True)     # EUP
                o_h = (acc_sc[head] * inv_l).astype(o_ref.dtype)
                if d_k % 128 == 0:
                    o_ref[0, :, head * d_k:(head + 1) * d_k] = o_h
                else:
                    outs.append(o_h)
            if d_k % 128 != 0:
                # Sub-128-lane per-head stores would be masked; do one
                # lane-dense [tq, h*d_k] store instead.
                o_ref[0] = jnp.concatenate(outs, axis=-1)

    return kernel


# --------------- Full-S attention that also emits probabilities -------------
def _make_attn_probs_kernel(h, d_k, with_bias):
    """Only used when return_attn=True: normalized rows need the full S_k row,
    and the [B,H,S,S] output is O(S^2) HBM anyway, so K/V stay resident here."""

    def kernel(*refs):
        if with_bias:
            q_ref, k_ref, v_ref, bias_ref, o_ref, a_ref = refs
        else:
            q_ref, k_ref, v_ref, o_ref, a_ref = refs
            bias_ref = None

        bias = bias_ref[0] if with_bias else None
        outs = []
        for head in range(h):
            lo, hi = head * d_k, (head + 1) * d_k
            q = q_ref[0, :, lo:hi]
            k = k_ref[0, :, lo:hi]
            v = v_ref[0, :, lo:hi]
            s = jax.lax.dot_general(
                q, k, (((1,), (1,)), ((), ())),
                preferred_element_type=jnp.float32)
            if with_bias:
                s = s + bias
            s = s - jnp.max(s, axis=-1, keepdims=True)
            p = jnp.exp(s)
            p = p * pl.reciprocal(jnp.sum(p, axis=-1, keepdims=True), approx=True)
            a_ref[0, head] = p.astype(a_ref.dtype)
            o_h = jnp.dot(p.astype(v.dtype), v,
                          preferred_element_type=jnp.float32).astype(o_ref.dtype)
            if d_k % 128 == 0:
                o_ref[0, :, lo:hi] = o_h
            else:
                outs.append(o_h)
        if d_k % 128 != 0:
            o_ref[0] = jnp.concatenate(outs, axis=-1)

    return kernel


def scaled_dot_product_attention(q, k, v, bias, h, d_model, *,
                                 q_off=0, k_off=0, v_off=0,
                                 return_attn=False, tq=256, tk=512):
    """q/k/v: [B, S, n*d_model] arrays; *_off selects the d_model column block
    (lets fused QKV / KV projection outputs be consumed in place)."""
    B, S_q = q.shape[0], q.shape[1]
    S_k = k.shape[1]
    d_k = d_model // h
    with_bias = bias is not None
    tq = _fit_tile(S_q, tq, 8)

    if return_attn:
        grid = (B, S_q // tq)
        in_specs = [
            pl.BlockSpec((1, tq, d_model), lambda b, qi, o=q_off: (b, qi, o)),
            pl.BlockSpec((1, S_k, d_model), lambda b, qi, o=k_off: (b, 0, o)),
            pl.BlockSpec((1, S_k, d_model), lambda b, qi, o=v_off: (b, 0, o)),
        ]
        args = [q, k, v]
        if with_bias:
            in_specs.append(pl.BlockSpec((1, 1, S_k), lambda b, qi: (b, 0, 0)))
            args.append(bias)
        out, attn = pl.pallas_call(
            _make_attn_probs_kernel(h, d_k, with_bias),
            out_shape=(jax.ShapeDtypeStruct((B, S_q, d_model), q.dtype),
                       jax.ShapeDtypeStruct((B, h, S_q, S_k), jnp.float32)),
            grid=grid,
            in_specs=in_specs,
            out_specs=(pl.BlockSpec((1, tq, d_model), lambda b, qi: (b, qi, 0)),
                       pl.BlockSpec((1, h, tq, S_k), lambda b, qi: (b, 0, qi, 0))),
            compiler_params=pltpu.CompilerParams(
                dimension_semantics=("parallel", "parallel"),
                vmem_limit_bytes=_VMEM_LIMIT),
        )(*args)
        return out, attn

    # Flash path: K/V tiled along the sequence axis; VMEM independent of S_k.
    tk = _fit_tile(S_k, tk, 128)
    grid = (B, S_q // tq, S_k // tk)
    in_specs = [
        pl.BlockSpec((1, tq, d_model), lambda b, qi, ki, o=q_off: (b, qi, o)),
        pl.BlockSpec((1, tk, d_model), lambda b, qi, ki, o=k_off: (b, ki, o)),
        pl.BlockSpec((1, tk, d_model), lambda b, qi, ki, o=v_off: (b, ki, o)),
    ]
    args = [q, k, v]
    if with_bias:
        in_specs.append(pl.BlockSpec((1, 1, tk), lambda b, qi, ki: (b, 0, ki)))
        args.append(bias)
    out = pl.pallas_call(
        _make_flash_attn_kernel(h, d_k, with_bias),
        out_shape=jax.ShapeDtypeStruct((B, S_q, d_model), q.dtype),
        grid_spec=pltpu.PrefetchScalarGridSpec(
            num_scalar_prefetch=0,
            grid=grid,
            in_specs=in_specs,
            out_specs=pl.BlockSpec((1, tq, d_model), lambda b, qi, ki: (b, qi, 0)),
            scratch_shapes=[
                pltpu.VMEM((h, tq, 1), jnp.float32),     # running max
                pltpu.VMEM((h, tq, 1), jnp.float32),     # running denominator
                pltpu.VMEM((h, tq, d_k), jnp.float32),   # running PV accumulator
            ],
        ),
        compiler_params=pltpu.CompilerParams(
            dimension_semantics=("parallel", "parallel", "arbitrary"),
            vmem_limit_bytes=_VMEM_LIMIT),
    )(*args)
    return out, None


# --------------------------- Parameters --------------------------------------
def init_params(key, d_model, dtype=jnp.float32):
    """Deterministic synthetic init of the 4 Linear(d_model, d_model) layers."""
    params = []
    bound = 1.0 / math.sqrt(d_model)
    for i in range(4):
        kw, kb = jax.random.split(jax.random.fold_in(key, i))
        w = jax.random.uniform(kw, (d_model, d_model), dtype, -bound, bound)
        b = jax.random.uniform(kb, (d_model,), dtype, -bound, bound)
        params.append((w, b))
    return params


def prepare_params(params, h):
    """One-time parameter preparation (hoisted out of the forward path):
      * fold 1/sqrt(d_k) into the Q projection (kernel never scales [tq,S] scores),
      * precompute the fused QKV / KV weight+bias concatenations."""
    (wq, bq), (wk, bk), (wv, bv), (wo, bo) = params
    d_model = wq.shape[0]
    d_k = d_model // h
    scale = 1.0 / math.sqrt(d_k)
    wq_s, bq_s = wq * scale, bq * scale
    return dict(
        wq=wq_s, bq=bq_s, wk=wk, bk=bk, wv=wv, bv=bv, wo=wo, bo=bo,
        w_qkv=jnp.concatenate([wq_s, wk, wv], axis=1),
        b_qkv=jnp.concatenate([bq_s, bk, bv], axis=0),
        w_kv=jnp.concatenate([wk, wv], axis=1),
        b_kv=jnp.concatenate([bk, bv], axis=0),
    )


# --------------------------- MultiHeadedAttention ----------------------------
def multi_headed_attention(query, key, value, mask, prepared, h, *, return_attn=False):
    """Forward pass matching the PyTorch MultiHeadedAttention module.

    query: [B, S_q, d_model]; key/value: [B, S_k, d_model]; mask: [B, 1, S_k] or None.
    Returns (output [B, S_q, d_model], attn [B, H, S_q, S_k] or None).
    """
    B, S_q, d_model = query.shape
    S_k = key.shape[1]
    assert d_model % h == 0

    # Precompute the mask once as an additive f32 bias (no per-head compare/select);
    # skipped entirely (kernel specialization) when mask is None.
    bias = None
    if mask is not None:
        bias = jnp.where(mask.reshape(B, 1, S_k) == 0,
                         jnp.float32(-1e9), jnp.float32(0.0))

    # In-place consumption of fused projection outputs needs 128-lane-aligned
    # d_model column blocks; otherwise fall back to HBM slices.
    inplace = (d_model % 128 == 0)

    if (query is key) and (query is value):
        # Self-attention: one [d_model, 3*d_model] projection (activations read once).
        qkv = linear(query.reshape(B * S_q, d_model),
                     prepared["w_qkv"], prepared["b_qkv"]).reshape(B, S_q, 3 * d_model)
        if inplace:
            x, attn = scaled_dot_product_attention(
                qkv, qkv, qkv, bias, h, d_model,
                q_off=0, k_off=1, v_off=2, return_attn=return_attn)
        else:
            x, attn = scaled_dot_product_attention(
                qkv[..., :d_model], qkv[..., d_model:2 * d_model],
                qkv[..., 2 * d_model:], bias, h, d_model, return_attn=return_attn)
    elif key is value:
        # Encoder-memory cross-attention: fuse the K and V projections.
        q = linear(query.reshape(B * S_q, d_model),
                   prepared["wq"], prepared["bq"]).reshape(B, S_q, d_model)
        kv = linear(key.reshape(B * S_k, d_model),
                    prepared["w_kv"], prepared["b_kv"]).reshape(B, S_k, 2 * d_model)
        if inplace:
            x, attn = scaled_dot_product_attention(
                q, kv, kv, bias, h, d_model,
                q_off=0, k_off=0, v_off=1, return_attn=return_attn)
        else:
            x, attn = scaled_dot_product_attention(
                q, kv[..., :d_model], kv[..., d_model:], bias, h, d_model,
                return_attn=return_attn)
    else:
        q = linear(query.reshape(B * S_q, d_model),
                   prepared["wq"], prepared["bq"]).reshape(B, S_q, d_model)
        k = linear(key.reshape(B * S_k, d_model),
                   prepared["wk"], prepared["bk"]).reshape(B, S_k, d_model)
        v = linear(value.reshape(B * S_k, d_model),
                   prepared["wv"], prepared["bv"]).reshape(B, S_k, d_model)
        x, attn = scaled_dot_product_attention(q, k, v, bias, h, d_model,
                                               return_attn=return_attn)

    out = linear(x.reshape(B * S_q, d_model),
                 prepared["wo"], prepared["bo"]).reshape(B, S_q, d_model)
    # TODO(synk): attention dropout omitted (inference-mode identity).
    return out, attn


# --------------------------- Pure-JAX reference ------------------------------
def _reference(query, key, value, mask, params, h):
    B, S_q, d_model = query.shape
    S_k = key.shape[1]
    d_k = d_model // h
    hp = jax.lax.Precision.HIGHEST

    def lin(x, w, b):
        return jnp.dot(x, w, precision=hp) + b

    def project(x, w, b, S):
        return lin(x, w, b).reshape(B, S, h, d_k).transpose(0, 2, 1, 3)

    q = project(query, *params[0], S_q)
    k = project(key, *params[1], S_k)
    v = project(value, *params[2], S_k)
    scores = jnp.einsum("bhqd,bhkd->bhqk", q, k, precision=hp) / math.sqrt(d_k)
    if mask is not None:
        m = mask.reshape(B, 1, 1, S_k)
        scores = jnp.where(m == 0, -1e9, scores)
    p = jax.nn.softmax(scores, axis=-1)
    x = jnp.einsum("bhqk,bhkd->bhqd", p, v, precision=hp)
    x = x.transpose(0, 2, 1, 3).reshape(B, S_q, d_model)
    return lin(x, *params[3]), p


if __name__ == "__main__":
    # Small but layout-realistic shapes: d_model keeps lane-aligned (128) head slices.
    B, S, d_model, h = 2, 8, 512, 4

    root = jax.random.PRNGKey(0)
    kx, kq, kk, kv, kp = jax.random.split(root, 5)
    params = init_params(kp, d_model)
    prepared = prepare_params(params, h)     # hoisted out of the forward path

    # 1) Self-attention (fused QKV), all-ones mask, attention probabilities requested.
    x_in = jax.random.normal(kx, (B, S, d_model), jnp.float32)
    mask = jnp.ones((B, 1, S), jnp.float32)
    out, attn = multi_headed_attention(x_in, x_in, x_in, mask, prepared, h,
                                       return_attn=True)
    out = jax.block_until_ready(out)
    attn = jax.block_until_ready(attn)
    ref_out, ref_attn = _reference(x_in, x_in, x_in, mask, params, h)
    assert out.shape == (B, S, d_model)
    assert attn.shape == (B, h, S, S)
    assert jnp.allclose(out, ref_out, atol=5e-3, rtol=5e-3)
    assert jnp.allclose(attn, ref_attn, atol=5e-3, rtol=5e-3)

    # 2) Cross-attention, separate projections, no mask (flash path, no bias add).
    query = jax.random.normal(kq, (B, S, d_model), jnp.float32)
    key_t = jax.random.normal(kk, (B, S, d_model), jnp.float32)
    value = jax.random.normal(kv, (B, S, d_model), jnp.float32)
    out2, attn2 = multi_headed_attention(query, key_t, value, None, prepared, h)
    out2 = jax.block_until_ready(out2)
    ref_out2, _ = _reference(query, key_t, value, None, params, h)
    assert attn2 is None
    assert jnp.allclose(out2, ref_out2, atol=5e-3, rtol=5e-3)

    # 3) Cross-attention with key is value (fused KV projection) and a real mask.
    mask3 = jnp.broadcast_to((jnp.arange(S) < S - 2).astype(jnp.float32), (B, 1, S))
    out3, _ = multi_headed_attention(query, key_t, key_t, mask3, prepared, h)
    out3 = jax.block_until_ready(out3)
    ref_out3, _ = _reference(query, key_t, key_t, mask3, params, h)
    assert jnp.allclose(out3, ref_out3, atol=5e-3, rtol=5e-3)

    print("KERNEL_OK")
</pallas_src>

<mosaic_0001>
module attributes {stable_mosaic.version = 11 : i64} {
  func.func @_linear_kernel(%arg0: i32, %arg1: i32, %arg2: i32, %arg3: memref<16x512xf32, #tpu.memory_space<vmem>>, %arg4: memref<512x256xf32, #tpu.memory_space<vmem>>, %arg5: memref<1x256xf32, #tpu.memory_space<vmem>>, %arg6: memref<16x256xf32, #tpu.memory_space<vmem>>, %arg7: memref<16x256xf32, #tpu.memory_space<vmem>>) attributes {dimension_semantics = [#tpu.dimension_semantics<parallel>, #tpu.dimension_semantics<parallel>, #tpu.dimension_semantics<arbitrary>], iteration_bounds = array<i64: 1, 6, 1>, scalar_prefetch = 0 : i64, scratch_operands = 1 : i64, tpu.core_type = #tpu.core_type<tc>, window_params = [{transform_indices = @transform_0, window_bounds = array<i64: 16, 512>}, {transform_indices = @transform_1, window_bounds = array<i64: 512, 256>}, {transform_indices = @transform_2, window_bounds = array<i64: 1, 256>}, {transform_indices = @transform_3, window_bounds = array<i64: 16, 256>}]} {
    %c0_i32 = arith.constant 0 : i32
    %0 = arith.cmpi eq, %arg2, %c0_i32 : i32
    %1 = arith.extui %0 : i1 to i32
    %c0_i32_0 = arith.constant 0 : i32
    %2 = arith.cmpi ne, %1, %c0_i32_0 : i32
    scf.if %2 {
      %cst_10 = arith.constant 0.000000e+00 : f32
      %12 = vector.broadcast %cst_10 : f32 to vector<16x256xf32>
      %c0_11 = arith.constant 0 : index
      %c0_12 = arith.constant 0 : index
      %13 = vector.load %arg7[%c0_11, %c0_12] : memref<16x256xf32, #tpu.memory_space<vmem>>, vector<16x256xf32>
      tpu.vector_store %arg7[%c0_11, %c0_12], %12 {strides = array<i32>} : memref<16x256xf32, #tpu.memory_space<vmem>>, vector<16x256xf32>,
    } else {
    }
    %c0 = arith.constant 0 : index
    %c0_1 = arith.constant 0 : index
    %3 = vector.load %arg7[%c0, %c0_1] : memref<16x256xf32, #tpu.memory_space<vmem>>, vector<16x256xf32>
    %c0_2 = arith.constant 0 : index
    %c0_3 = arith.constant 0 : index
    %4 = vector.load %arg3[%c0_2, %c0_3] : memref<16x512xf32, #tpu.memory_space<vmem>>, vector<16x512xf32>
    %c0_4 = arith.constant 0 : index
    %c0_5 = arith.constant 0 : index
    %5 = vector.load %arg4[%c0_4, %c0_5] : memref<512x256xf32, #tpu.memory_space<vmem>>, vector<512x256xf32>
    %cst = arith.constant dense<0.000000e+00> : vector<16x256xf32>
    %6 = tpu.matmul %4, %5, %cst {dimension_numbers = #tpu.dot_dimension_numbers<[1], [0], [0], [1], [0, 0, 1, 1], [], []>} : vector<16x512xf32>, vector<512x256xf32>, vector<16x256xf32> -> vector<16x256xf32>
    %7 = arith.addf %3, %6 : vector<16x256xf32>
    %c0_6 = arith.constant 0 : index
    %c0_7 = arith.constant 0 : index
    %8 = vector.load %arg7[%c0_6, %c0_7] : memref<16x256xf32, #tpu.memory_space<vmem>>, vector<16x256xf32>
    tpu.vector_store %arg7[%c0_6, %c0_7], %7 {strides = array<i32>} : memref<16x256xf32, #tpu.memory_space<vmem>>, vector<16x256xf32>,
    %c0_i32_8 = arith.constant 0 : i32
    %9 = arith.cmpi eq, %arg2, %c0_i32_8 : i32
    %10 = arith.extui %9 : i1 to i32
    %c0_i32_9 = arith.constant 0 : i32
    %11 = arith.cmpi ne, %10, %c0_i32_9 : i32
    scf.if %11 {
      %c0_10 = arith.constant 0 : index
      %c0_11 = arith.constant 0 : index
      %12 = vector.load %arg7[%c0_10, %c0_11] : memref<16x256xf32, #tpu.memory_space<vmem>>, vector<16x256xf32>
      %c0_12 = arith.constant 0 : index
      %c0_13 = arith.constant 0 : index
      %13 = vector.load %arg5[%c0_12, %c0_13] : memref<1x256xf32, #tpu.memory_space<vmem>>, vector<1x256xf32>
      %14 = vector.broadcast %13 : vector<1x256xf32> to vector<16x256xf32>
      %15 = arith.addf %12, %14 : vector<16x256xf32>
      %c0_14 = arith.constant 0 : index
      %c0_15 = arith.constant 0 : index
      %16 = vector.load %arg6[%c0_14, %c0_15] : memref<16x256xf32, #tpu.memory_space<vmem>>, vector<16x256xf32>
      tpu.vector_store %arg6[%c0_14, %c0_15], %15 {strides = array<i32>} : memref<16x256xf32, #tpu.memory_space<vmem>>, vector<16x256xf32>,
    } else {
    }
    return
  }
  func.func @transform_0(%arg0: i32, %arg1: i32, %arg2: i32) -> (i32, i32) {
    %c0_i32 = arith.constant 0 : i32
    return %arg0, %arg2 : i32, i32
  }
  func.func @transform_1(%arg0: i32, %arg1: i32, %arg2: i32) -> (i32, i32) {
    %c0_i32 = arith.constant 0 : i32
    return %arg2, %arg1 : i32, i32
  }
  func.func @transform_2(%arg0: i32, %arg1: i32, %arg2: i32) -> (i32, i32) {
    %c0_i32 = arith.constant 0 : i32
    %c0_i32_0 = arith.constant 0 : i32
    return %c0_i32, %arg1 : i32, i32
  }
  func.func @transform_3(%arg0: i32, %arg1: i32, %arg2: i32) -> (i32, i32) {
    %c0_i32 = arith.constant 0 : i32
    return %arg0, %arg1 : i32, i32
  }
}

</mosaic_0001>

<bundles_post_ra>
// kernel: tpu_custom_call.1
= control target key start
LH: loop header
LB: loop body
LE: loop exit
PB: predicated region body
PF: predicated region fallthrough
CT: control target
= control target key end

     0   :  { %s1603_s0 = inlined_call_operand.hbm [shape: f32[16,512], index: 0, kind: input, shape index: {}]   ;;  %s1604_s1 = inlined_call_operand.hbm [shape: f32[512,1536], index: 1, kind: input, shape index: {}]   ;;  %s1605_s2 = inlined_call_operand.hbm [shape: f32[1,1536], index: 2, kind: input, shape index: {}]   ;;  %s1606_s3 = inlined_call_operand.hbm [shape: f32[16,1536], index: 3, kind: output, shape index: {}]  }
   0x1   :  { %1615 = sst [smem:[#allocation14_spill]] %s1604_s1 }
   0x2   :  { %8 = vsyncpa [#allocation4], 0 }
   0x3   :  { %9 = vsyncpa [#allocation7], 0 }
   0x4   :  { %11 = vsyncpa [#allocation7 + $0x1], 0 }
   0x5   :  { %12 = vsyncpa [#allocation5], 0 }
   0x6   :  { %14 = vsyncpa [#allocation5 + $0x1], 0  ;;  %s1216_s12 = smov 0   ;;  %s1218_s13 = smov 0  }
   0x7   :  { %s1220_s14 = smov 0   ;;  %s1222_s15 = smov 0  }
   0x8   :  { %s1224_s16 = smov 0   ;;  %s1226_s17 = smov 0  }
   0x9 LB: > { %s35_s18 = sadd.s32 1, %s1178_s16  ;;  %s76_s19 = sadd.s32 1, %s1170_s14  ;;  %s1182_s17 = sphi %s1226_s17, %s20_s17   ;;  %s1178_s16 = sphi %s1224_s16, %s1638_s16   ;;  %s1174_s15 = sphi %s1222_s15, %s1637_s15   ;;  %s1170_s14 = sphi %s1220_s14, %s1636_s14   ;;  %s1166_s13 = sphi %s1218_s13, %s1635_s13   ;;  %s1162_s12 = sphi %s1216_s12, %s1634_s12  }
   0xa   : > { %p37_p0 = scmp.ge.s32.totalorder %s35_s18, 6  ;;  %p83_p1 = scmp.ne.s32.totalorder %s1170_s14, %s1166_s13 }
   0xb   : > { %p84_p2 = scmp.eq.s32.totalorder %s1182_s17, 0  ;;  %p948_p4 = scmp.lt.s32.totalorder %s1182_s17, 6 }
   0xc   : > { %s1640_s18 = smov (%p37_p0, %s35_s18), 0  ;;  %s186_s21 = sand.u32 1, %s1182_s17  }
   0xd   : > { %1616 = sst [smem:[#allocation13_spill]] %s1640_s18  ;;  %p85_p3 = por %p84_p2, %p83_p1 }
   0xe   : > { %s72_s20 = ssub.s32 %s1178_s16, %s1640_s18  ;;  %s188_s22 = sand.u32 1, %s1170_s14  }
   0xf   : > { %p74_p5 = scmp.eq.s32.totalorder %s72_s20, 0  ;;  %s787_s23 = sshll.u32 %s1178_s16, 8 }
  0x10   : > { %s771_s25 = sshll.u32 %s188_s22, 10  ;;  %s1617_s1 = sld [smem:[#allocation14_spill]] }
  0x11   : > { %s1263_s24 = scalar_select %p74_p5, %s1170_s14, %s76_s19  }
  0x12   : > { %p1272_p6 = pnand %p948_p4, %p85_p3  ;;  %s190_s30 = scalar_lea.vmem [#allocation6], %s771_s25 }
  0x13   : > { %s200_s4 = sshll.u32 %s190_s30, 4  ;;  %s1278_s5 = scalar_lea.sflag [#allocation7], %s186_s21  ;;  %s1276_s4 = int_to_ptr.vmem [resolvable:$true] %s200_s4 }
  0x14   : > { %s1618_s29 = scalar_select %p1272_p6, 1, 0 }
  0x15   : > { %p1609_p8 = pneg %p1272_p6 }
  0x16   : > { %s1270_s28 = scalar_lea.hbm %s1617_s1, %s787_s23  ;;  %s1013_s9 = scalar_lea.hbm %s1617_s1, 98304 }
  0x17   : > { %s1008_s6 = scalar_lea.hbm %s1270_s28, 16384  ;;  %p1014_p11 = scmp.lt.u32.totalorder %s1270_s28, %s1617_s1 }
  0x18   : > { %p1009_p7 = scmp.ne.s32.totalorder %s1270_s28, %s1008_s6  ;;  %p1015_p12 = scmp.lt.u32.totalorder %s1013_s9, %s1008_s6 }
  0x19   : > { %p1017_p0 = scmp.lt.u32.totalorder %s1008_s6, %s1270_s28 }
  0x1a   : > { %p1011_p9 = pnand %p1609_p8, %p1009_p7  ;;  %p1016_p13 = por %p1015_p12, %p1014_p11 }
  0x1c   : > { %p1012_p10 = pneg %p1011_p9  ;;  %p1018_p2 = por %p1017_p0, %p1016_p13 }
  0x1e   : > { %p1019_p3 = pnand %p1018_p2, %p1012_p10 }
  0x20   : > { %1022 = shalt.err (!%p1019_p3)
}
  0x21   : > { %s1023_s19 = scalar_lea.vmem %s1276_s4, 16384  ;;  %s1184_s20 = smov [#allocation6]  }
  0x22   : > { %p1024_p4 = scmp.ne.s32.totalorder %s1276_s4, %s1023_s19  ;;  %s1028_s21 = sshll.u32 %s1184_s20, 4  ;;  %s1029_s21 = int_to_ptr.vmem [resolvable:$false] %s1028_s21 }
  0x23   : > { %s1030_s23 = scalar_lea.vmem %s1029_s21, 32768  ;;  %p1031_p9 = scmp.lt.s32.totalorder %s1276_s4, %s1029_s21 }
  0x24   : > { %p1026_p5 = pnand %p1024_p4, %p1609_p8  ;;  %p1032_p11 = scmp.lt.s32.totalorder %s1030_s23, %s1023_s19 }
  0x26   : > { %p1027_p7 = pneg %p1026_p5  ;;  %p1033_p12 = por %p1032_p11, %p1031_p9 }
  0x28   : > { %p1034_p13 = pnand %p1033_p12, %p1027_p7 }
  0x2a   : > { %1037 = shalt.err (!%p1034_p13)
}
  0x2b   : > { %s1185_s25 = smov 1536   ;;  %s1186_s26 = smov 256  }
  0x2c   : > { %s1187_s27 = smov 16   ;;  %s1307_s30 = sadd.s32 4294967295, %s1182_s17  }
  0x2d   : > { %939 = dma.hbm_to_vmem [thread:$0]  (!%p1272_p6), %s1270_s28, 16384, %s1276_s4, %s1278_s5, %s1185_s25, %s1186_s26, %s1187_s27  }
  0x2e   : > { %s767_s6 = sadd.s32 4294967294, %s1182_s17   ;;  %p89_p10 = scmp.ne.s32.totalorder %s1166_s13, %s1162_s12 }
  0x2f   : > { %p1608_p0 = scmp.eq.s32.totalorder %s1307_s30, 0  ;;  %p141_p2 = scmp.eq.s32.totalorder %s1307_s30, 5 }
  0x30   : > { %p147_p3 = scmp.eq.s32.totalorder %s767_s6, 5  ;;  %p768_p5 = scmp.ge.s32.totalorder %s1182_s17, 1 }
  0x31   : > { %p1316_p4 = por %p1608_p0, %p89_p10  ;;  %p1324_p7 = por %p141_p2, %p83_p1 }
  0x32   : > { %p1328_p9 = por %p147_p3, %p89_p10  ;;  %p154_p11 = scmp.lt.s32.totalorder %s1182_s17, 7 }
  0x33   : > { %s1619_s7 = scalar_select %p1316_p4, 1, 0 }
  0x34   : > { %s1620_s28 = scalar_select %p1324_p7, 1, 0 }
  0x35   : > { %s1621_s4 = scalar_select %p1328_p9, 1, 0 }
  0x36   : > { %p1333_p12 = pnand %p768_p5, %p154_p11  ;;  %s1188_s9 = smov [#allocation3]  }
  0x37   : > { %s172_s10 = sshll.u32 %s1188_s9, 4  ;;  %s774_s11 = sshll.u32 %s188_s22, 1  ;;  %s1337_s10 = int_to_ptr.vmem [resolvable:$true] %s172_s10 }
  0x38   : > { %s1622_s8 = scalar_select %p1333_p12, 1, 0 }
  0x39   : > { %p932_p13 = pneg %p1333_p12  ;;  %s788_s19 = sshll.u32 %s1178_s16, 5 }
  0x3a   : > { %s1353_s25 = scalar_lea.hbm %s1605_s2, %s788_s19  ;;  %s214_s26 = scalar_lea.vmem [#allocation8], %s774_s11 }
  0x3b   : > { %p1346_p1 = pnand %p932_p13, %p1608_p0  ;;  %s222_s27 = sshll.u32 %s214_s26, 4  ;;  %s1355_s27 = int_to_ptr.vmem [resolvable:$true] %s222_s27 }
  0x3c   : > { %s1038_s22 = scalar_lea.hbm %s1603_s0, 1024 }
  0x3d   : > { %p1039_p10 = scmp.ne.s32.totalorder %s1603_s0, %s1038_s22  ;;  %p1040_p2 = pneg %p1346_p1 }
  0x3e   : > { %p1045_p11 = scmp.lt.u32.totalorder %s1038_s22, %s1603_s0 }
  0x3f   : > { %p1041_p3 = pnand %p1040_p2, %p1039_p10 }
  0x41   : > { %p1042_p5 = pneg %p1041_p3 }
  0x43   : > { %p1047_p13 = pnand %p1045_p11, %p1042_p5 }
  0x45   : > { %1050 = shalt.err (!%p1047_p13)
}
  0x46   : > { %s1051_s11 = scalar_lea.vmem %s1337_s10, 1024  ;;  %p1059_p7 = scmp.lt.s32.totalorder %s1337_s10, %s1337_s10 }
  0x47   : > { %p1052_p0 = scmp.ne.s32.totalorder %s1337_s10, %s1051_s11  ;;  %p1060_p4 = scmp.lt.s32.totalorder %s1051_s11, %s1051_s11 }
  0x49   : > { %p1054_p8 = pnand %p1052_p0, %p1040_p2  ;;  %p1061_p12 = por %p1060_p4, %p1059_p7 }
  0x4b   : > { %p1055_p9 = pneg %p1054_p8 }
  0x4d   : > { %p1062_p6 = pnand %p1061_p12, %p1055_p9 }
  0x4f   : > { %1065 = shalt.err (!%p1062_p6)
}
  0x50   : > { %s1189_s1 = smov 512   ;;  %s1190_s18 = smov 32  }
  0x51   : > { %935 = dma.hbm_to_vmem [thread:$0]  (!%p1346_p1), %s1603_s0, 1024, %s1337_s10, [#allocation4], %s1189_s1, %s1189_s1, %s1190_s18  }
  0x52   : > { %s1066_s6 = scalar_lea.hbm %s1353_s25, 32  ;;  %p1624_p0 = scmp.ne.s32.totalorder %s1618_s29, 0 }
  0x53   : > { %p1067_p8 = scmp.ne.s32.totalorder %s1353_s25, %s1066_s6  ;;  %s1071_s21 = scalar_lea.hbm %s1605_s2, 192 }
  0x54   : > { %p1625_p4 = pneg %p1624_p0  ;;  %p1072_p9 = scmp.lt.u32.totalorder %s1353_s25, %s1605_s2 }
  0x55   : > { %p1073_p12 = scmp.lt.u32.totalorder %s1071_s21, %s1066_s6  ;;  %p1075_p2 = scmp.lt.u32.totalorder %s1066_s6, %s1353_s25 }
  0x56   : > { %p1069_p7 = pnand %p1067_p8, %p1625_p4 }
  0x57   : > { %p1074_p10 = por %p1073_p12, %p1072_p9 }
  0x58   : > { %p1070_p6 = pneg %p1069_p7 }
  0x59   : > { %p1076_p3 = por %p1075_p2, %p1074_p10 }
  0x5b   : > { %p1077_p5 = pnand %p1076_p3, %p1070_p6 }
  0x5d   : > { %1080 = shalt.err (!%p1077_p5)
}
  0x5e   : > { %s1081_s10 = scalar_lea.vmem %s1355_s27, 32  ;;  %p1626_p11 = pmov %p1625_p4 }
  0x5f   : > { %p1082_p1 = scmp.ne.s32.totalorder %s1355_s27, %s1081_s10  ;;  %s1191_s20 = smov [#allocation8]  }
  0x60   : > { %s1086_s1 = sshll.u32 %s1191_s20, 4  ;;  %s1087_s1 = int_to_ptr.vmem [resolvable:$false] %s1086_s1 }
  0x61   : > { %p1084_p13 = pnand %p1082_p1, %p1626_p11  ;;  %s1088_s18 = scalar_lea.vmem %s1087_s1, 64 }
  0x62   : > { %p1089_p4 = scmp.lt.s32.totalorder %s1355_s27, %s1087_s1  ;;  %p1090_p7 = scmp.lt.s32.totalorder %s1088_s18, %s1081_s10 }
  0x63   : > { %p1085_p8 = pneg %p1084_p13 }
  0x64   : > { %p1091_p9 = por %p1090_p7, %p1089_p4 }
  0x66   : > { %p1092_p12 = pnand %p1091_p9, %p1085_p8 }
  0x68   : > { %1095 = shalt.err (!%p1092_p12)
}
  0x69   : > { %942 = dma.hbm_to_vmem [thread:$0]  (!%p1624_p0), %s1353_s25, 32, %s1355_s27, %s1278_s5  }
  0x6a   : > { %p1627_p6 = scmp.ne.s32.totalorder %s1622_s8, 0 }
  0x6b   : > { %p1628_p10 = scmp.eq.s32.totalorder (!%p1627_p6), %s1307_s30, 0 }
  0x6c   : > { %231 = sbr.rel (%p1627_p6) target bundleno = 427 (0x1ab), region = 32 }
  0x73   : > { %1149 = dma.done.wait (%p1628_p10), [#allocation4], 1024   ;;  %p1629_p2 = pmov %p1628_p10 }
  0x74   : > { %s237_s19 = sand.u32 1, %s1307_s30   ;;  %s1410_s26 = sand.u32 1, %s1166_s13  }
  0x75   : > { %1151 = vsyncadd (%p1629_p2), [#allocation4], 4294966272  ;;  %s779_s29 = sshll.u32 %s1410_s26, 10  ;;  %s238_s6 = scalar_lea.sflag [#allocation7], %s237_s19 }
  0x76   : > { %s1413_s9 = scalar_lea.vmem [#allocation6], %s779_s29  ;;  %p1630_p0 = scmp.ne.s32.totalorder %s1619_s7, 0 }
  0x78   : > { %1153 = dma.done.wait (%p1630_p0), %s238_s6, 16416  }
  0x79   : > { %1155 = vsyncadd (%p1630_p0), %s238_s6, 4294950880  ;;  %v306_v0 = vld [vmem:[%s1413_s9 + $0x8] sm:$0xff]  ;;  %v308_v1 = vld [vmem:[%s1413_s9 + $0x18] sm:$0xff]  ;;  %s780_s5 = sshll.u32 %s1410_s26, 1  ;;  %s781_s7 = sshll.u32 %s1410_s26, 5 }
  0x7a   : > { %v370_v2 = vld [vmem:[%s1413_s9 + $0x208] sm:$0xff]  ;;  %v790_v3 = vpack.c.bf16 %v308_v1, %v306_v0  ;;  %v372_v4 = vld [vmem:[%s1413_s9 + $0x218] sm:$0xff]  ;;  %v305_v5 = vld [vmem:[%s1413_s9] sm:$0xff]  ;;  %s250_s30 = scalar_lea.vmem [#allocation8], %s780_s5  ;;  %s277_s8 = scalar_lea.vmem [#allocation9], %s781_s7 }
  0x7b   : > { %v307_v6 = vld [vmem:[%s1413_s9 + $0x10] sm:$0xff]  ;;  %v854_v7 = vpack.c.bf16 %v372_v4, %v370_v2  ;;  %v369_v9 = vld [vmem:[%s1413_s9 + $0x200] sm:$0xff]  ;;  %v310_v11 = vld [vmem:[%s1413_s9 + $0x28] sm:$0xff]  ;;  %s639_s25 = sshll.u32 %s277_s8, 4  ;;  %s789_s27 = sshll.u32 %s1174_s15, 8  ;;  %s1550_s25 = int_to_ptr.vmem [resolvable:$true] %s639_s25 }
  0x7c   : > { %v792_v8 = vpack.c.bf16 %v307_v6, %v305_v5  ;;  %v371_v10 = vld [vmem:[%s1413_s9 + $0x210] sm:$0xff]  ;;  %791 = vmatprep.subr.bf16.mxu1 %v790_v3  ;;  %v312_v13 = vld [vmem:[%s1413_s9 + $0x38] sm:$0xff]  ;;  %v374_v14 = vld [vmem:[%s1413_s9 + $0x228] sm:$0xff]  ;;  %s1555_s23 = scalar_lea.hbm %s1606_s3, %s789_s27  ;;  %s623_s15 = scalar_lea.sflag [#allocation5], %s1410_s26 }
  0x7d   : > { %v856_v12 = vpack.c.bf16 %v371_v10, %v369_v9  ;;  %v376_v15 = vld [vmem:[%s1413_s9 + $0x238] sm:$0xff]  ;;  %855 = vmatprep.subr.bf16.mxu0 %v854_v7  ;;  %v794_v16 = vpack.c.bf16 %v312_v13, %v310_v11  ;;  %v309_v18 = vld [vmem:[%s1413_s9 + $0x20] sm:$0xff]  ;;  %v311_v19 = vld [vmem:[%s1413_s9 + $0x30] sm:$0xff]  ;;  %s1096_s11 = scalar_lea.vmem %s1550_s25, 512  ;;  %p1631_p5 = scmp.ne.s32.totalorder %s1620_s28, 0 }
  0x7e   : > { %793 = vmatpush1.bf16.msra.mxu1 %v792_v8  ;;  %v858_v17 = vpack.c.bf16 %v376_v15, %v374_v14  ;;  %v373_v20 = vld [vmem:[%s1413_s9 + $0x220] sm:$0xff]  ;;  %v796_v21 = vpack.c.bf16 %v311_v19, %v309_v18  ;;  %v375_v22 = vld [vmem:[%s1413_s9 + $0x230] sm:$0xff]  ;;  %v314_v23 = vld [vmem:[%s1413_s9 + $0x48] sm:$0xff]  ;;  %p1097_p3 = scmp.ne.s32.totalorder %s1550_s25, %s1096_s11  ;;  %s1192_s10 = smov [#allocation9]  }
  0x7f   : > { %857 = vmatpush1.bf16.msra.mxu0 %v856_v12  ;;  %v316_v24 = vld [vmem:[%s1413_s9 + $0x58] sm:$0xff]  ;;  %795 = vmatprep.subr.bf16.mxu1 %v794_v16  ;;  %v860_v25 = vpack.c.bf16 %v375_v22, %v373_v20  ;;  %v378_v27 = vld [vmem:[%s1413_s9 + $0x248] sm:$0xff]  ;;  %v313_v29 = vld [vmem:[%s1413_s9 + $0x40] sm:$0xff]  ;;  %s1100_s20 = sshll.u32 %s1192_s10, 4  ;;  %s1101_s20 = int_to_ptr.vmem [resolvable:$false] %s1100_s20 }
  0x80   : > { %859 = vmatprep.subr.bf16.mxu0 %v858_v17  ;;  %v798_v26 = vpack.c.bf16 %v316_v24, %v314_v23  ;;  %v380_v28 = vld [vmem:[%s1413_s9 + $0x258] sm:$0xff]  ;;  %v315_v31 = vld [vmem:[%s1413_s9 + $0x50] sm:$0xff]  ;;  %v377_v32 = vld [vmem:[%s1413_s9 + $0x240] sm:$0xff]  ;;  %p1098_p1 = pnand %p1097_p3, %p1631_p5  ;;  %s1102_s1 = scalar_lea.vmem %s1101_s20, 1024 }
  0x81   : > { %v862_v30 = vpack.c.bf16 %v380_v28, %v378_v27  ;;  %v379_v33 = vld [vmem:[%s1413_s9 + $0x250] sm:$0xff]  ;;  %v800_v34 = vpack.c.bf16 %v315_v31, %v313_v29  ;;  %v318_v35 = vld [vmem:[%s1413_s9 + $0x68] sm:$0xff]  ;;  %v320_v36 = vld [vmem:[%s1413_s9 + $0x78] sm:$0xff]  ;;  %p1103_p13 = scmp.lt.s32.totalorder %s1550_s25, %s1101_s20  ;;  %p1104_p8 = scmp.lt.s32.totalorder %s1102_s1, %s1096_s11 }
  0x82   : > { %797 = vmatpush1.bf16.msra.mxu1 %v796_v21  ;;  %v382_v37 = vld [vmem:[%s1413_s9 + $0x268] sm:$0xff]  ;;  %v864_v38 = vpack.c.bf16 %v379_v33, %v377_v32  ;;  %v802_v39 = vpack.c.bf16 %v320_v36, %v318_v35  ;;  %v384_v40 = vld [vmem:[%s1413_s9 + $0x278] sm:$0xff]  ;;  %v317_v41 = vld [vmem:[%s1413_s9 + $0x60] sm:$0xff]  ;;  %p1099_p11 = pneg %p1098_p1 }
  0x83   : > { %861 = vmatpush1.bf16.msra.mxu0 %v860_v25  ;;  %799 = vmatprep.subr.bf16.mxu1 %v798_v26  ;;  %v319_v42 = vld [vmem:[%s1413_s9 + $0x70] sm:$0xff]  ;;  %v866_v43 = vpack.c.bf16 %v384_v40, %v382_v37  ;;  %v381_v44 = vld [vmem:[%s1413_s9 + $0x260] sm:$0xff]  ;;  %v322_v46 = vld [vmem:[%s1413_s9 + $0x88] sm:$0xff]  ;;  %p1105_p4 = por %p1104_p8, %p1103_p13 }
  0x84   : > { %863 = vmatprep.subr.bf16.mxu0 %v862_v30  ;;  %v383_v45 = vld [vmem:[%s1413_s9 + $0x270] sm:$0xff]  ;;  %v324_v47 = vld [vmem:[%s1413_s9 + $0x98] sm:$0xff]  ;;  %v386_v48 = vld [vmem:[%s1413_s9 + $0x288] sm:$0xff]  ;;  %v804_v50 = vpack.c.bf16 %v319_v42, %v317_v41 }
  0x85   : > { %v388_v49 = vld [vmem:[%s1413_s9 + $0x298] sm:$0xff]  ;;  %v868_v51 = vpack.c.bf16 %v383_v45, %v381_v44  ;;  %v806_v52 = vpack.c.bf16 %v324_v47, %v322_v46  ;;  %v321_v53 = vld [vmem:[%s1413_s9 + $0x80] sm:$0xff]  ;;  %v323_v54 = vld [vmem:[%s1413_s9 + $0x90] sm:$0xff]  ;;  %p1106_p7 = pnand %p1105_p4, %p1099_p11 }
  0x86   : > { %801 = vmatpush1.bf16.msra.mxu1 %v800_v34  ;;  %v385_v55 = vld [vmem:[%s1413_s9 + $0x280] sm:$0xff]  ;;  %v870_v56 = vpack.c.bf16 %v388_v49, %v386_v48  ;;  %v387_v57 = vld [vmem:[%s1413_s9 + $0x290] sm:$0xff]  ;;  %v326_v58 = vld [vmem:[%s1413_s9 + $0xa8] sm:$0xff]  ;;  %v808_v62 = vpack.c.bf16 %v323_v54, %v321_v53 }
  0x87   : > { %865 = vmatpush1.bf16.msra.mxu0 %v864_v38  ;;  %803 = vmatprep.subr.bf16.mxu1 %v802_v39  ;;  %v328_v59 = vld [vmem:[%s1413_s9 + $0xb8] sm:$0xff]  ;;  %v390_v60 = vld [vmem:[%s1413_s9 + $0x2a8] sm:$0xff]  ;;  %v872_v63 = vpack.c.bf16 %v387_v57, %v385_v55  ;;  %v325_v1 = vld [vmem:[%s1413_s9 + $0xa0] sm:$0xff] }
  0x88   : > { %867 = vmatprep.subr.bf16.mxu0 %v866_v43  ;;  %v392_v61 = vld [vmem:[%s1413_s9 + $0x2b8] sm:$0xff]  ;;  %v810_v0 = vpack.c.bf16 %v328_v59, %v326_v58  ;;  %v327_v2 = vld [vmem:[%s1413_s9 + $0xb0] sm:$0xff]  ;;  %v389_v3 = vld [vmem:[%s1413_s9 + $0x2a0] sm:$0xff] }
  0x89   : > { %v874_v4 = vpack.c.bf16 %v392_v61, %v390_v60  ;;  %v391_v5 = vld [vmem:[%s1413_s9 + $0x2b0] sm:$0xff]  ;;  %v330_v6 = vld [vmem:[%s1413_s9 + $0xc8] sm:$0xff]  ;;  %v332_v7 = vld [vmem:[%s1413_s9 + $0xd8] sm:$0xff]  ;;  %v812_v10 = vpack.c.bf16 %v327_v2, %v325_v1 }
  0x8a   : > { %805 = vmatpush1.bf16.msra.mxu1 %v804_v50  ;;  %v394_v8 = vld [vmem:[%s1413_s9 + $0x2c8] sm:$0xff]  ;;  %v396_v9 = vld [vmem:[%s1413_s9 + $0x2d8] sm:$0xff]  ;;  %v876_v11 = vpack.c.bf16 %v391_v5, %v389_v3  ;;  %v814_v12 = vpack.c.bf16 %v332_v7, %v330_v6  ;;  %v329_v13 = vld [vmem:[%s1413_s9 + $0xc0] sm:$0xff] }
  0x8b   : > { %869 = vmatpush1.bf16.msra.mxu0 %v868_v51  ;;  %807 = vmatprep.subr.bf16.mxu1 %v806_v52  ;;  %v331_v14 = vld [vmem:[%s1413_s9 + $0xd0] sm:$0xff]  ;;  %v393_v15 = vld [vmem:[%s1413_s9 + $0x2c0] sm:$0xff]  ;;  %v878_v16 = vpack.c.bf16 %v396_v9, %v394_v8  ;;  %v334_v18 = vld [vmem:[%s1413_s9 + $0xe8] sm:$0xff] }
  0x8c   : > { %871 = vmatprep.subr.bf16.mxu0 %v870_v56  ;;  %v395_v17 = vld [vmem:[%s1413_s9 + $0x2d0] sm:$0xff]  ;;  %v336_v19 = vld [vmem:[%s1413_s9 + $0xf8] sm:$0xff]  ;;  %v398_v20 = vld [vmem:[%s1413_s9 + $0x2e8] sm:$0xff]  ;;  %v816_v22 = vpack.c.bf16 %v331_v14, %v329_v13 }
  0x8d   : > { %v400_v21 = vld [vmem:[%s1413_s9 + $0x2f8] sm:$0xff]  ;;  %v880_v23 = vpack.c.bf16 %v395_v17, %v393_v15  ;;  %v818_v24 = vpack.c.bf16 %v336_v19, %v334_v18  ;;  %v333_v25 = vld [vmem:[%s1413_s9 + $0xe0] sm:$0xff]  ;;  %v335_v26 = vld [vmem:[%s1413_s9 + $0xf0] sm:$0xff] }
  0x8e   : > { %809 = vmatpush1.bf16.msra.mxu1 %v808_v62  ;;  %v397_v27 = vld [vmem:[%s1413_s9 + $0x2e0] sm:$0xff]  ;;  %v882_v28 = vpack.c.bf16 %v400_v21, %v398_v20  ;;  %v399_v29 = vld [vmem:[%s1413_s9 + $0x2f0] sm:$0xff]  ;;  %v338_v30 = vld [vmem:[%s1413_s9 + $0x108] sm:$0xff]  ;;  %v820_v34 = vpack.c.bf16 %v335_v26, %v333_v25 }
  0x8f   : > { %873 = vmatpush1.bf16.msra.mxu0 %v872_v63  ;;  %811 = vmatprep.subr.bf16.mxu1 %v810_v0  ;;  %v340_v31 = vld [vmem:[%s1413_s9 + $0x118] sm:$0xff]  ;;  %v402_v32 = vld [vmem:[%s1413_s9 + $0x308] sm:$0xff]  ;;  %v884_v35 = vpack.c.bf16 %v399_v29, %v397_v27  ;;  %v337_v37 = vld [vmem:[%s1413_s9 + $0x100] sm:$0xff] }
  0x90   : > { %875 = vmatprep.subr.bf16.mxu0 %v874_v4  ;;  %v404_v33 = vld [vmem:[%s1413_s9 + $0x318] sm:$0xff]  ;;  %v822_v36 = vpack.c.bf16 %v340_v31, %v338_v30  ;;  %v339_v38 = vld [vmem:[%s1413_s9 + $0x110] sm:$0xff]  ;;  %v401_v39 = vld [vmem:[%s1413_s9 + $0x300] sm:$0xff] }
  0x91   : > { %v886_v40 = vpack.c.bf16 %v404_v33, %v402_v32  ;;  %v403_v41 = vld [vmem:[%s1413_s9 + $0x310] sm:$0xff]  ;;  %v342_v42 = vld [vmem:[%s1413_s9 + $0x128] sm:$0xff]  ;;  %v344_v43 = vld [vmem:[%s1413_s9 + $0x138] sm:$0xff]  ;;  %v824_v46 = vpack.c.bf16 %v339_v38, %v337_v37 }
  0x92   : > { %813 = vmatpush1.bf16.msra.mxu1 %v812_v10  ;;  %v406_v44 = vld [vmem:[%s1413_s9 + $0x328] sm:$0xff]  ;;  %v408_v45 = vld [vmem:[%s1413_s9 + $0x338] sm:$0xff]  ;;  %v888_v47 = vpack.c.bf16 %v403_v41, %v401_v39  ;;  %v826_v48 = vpack.c.bf16 %v344_v43, %v342_v42  ;;  %v341_v49 = vld [vmem:[%s1413_s9 + $0x120] sm:$0xff] }
  0x93   : > { %877 = vmatpush1.bf16.msra.mxu0 %v876_v11  ;;  %815 = vmatprep.subr.bf16.mxu1 %v814_v12  ;;  %v343_v50 = vld [vmem:[%s1413_s9 + $0x130] sm:$0xff]  ;;  %v405_v51 = vld [vmem:[%s1413_s9 + $0x320] sm:$0xff]  ;;  %v890_v52 = vpack.c.bf16 %v408_v45, %v406_v44  ;;  %v346_v54 = vld [vmem:[%s1413_s9 + $0x148] sm:$0xff] }
  0x94   : > { %879 = vmatprep.subr.bf16.mxu0 %v878_v16  ;;  %v407_v53 = vld [vmem:[%s1413_s9 + $0x330] sm:$0xff]  ;;  %v348_v55 = vld [vmem:[%s1413_s9 + $0x158] sm:$0xff]  ;;  %v410_v56 = vld [vmem:[%s1413_s9 + $0x348] sm:$0xff]  ;;  %v828_v58 = vpack.c.bf16 %v343_v50, %v341_v49 }
  0x95   : > { %v412_v57 = vld [vmem:[%s1413_s9 + $0x358] sm:$0xff]  ;;  %v892_v59 = vpack.c.bf16 %v407_v53, %v405_v51  ;;  %v830_v60 = vpack.c.bf16 %v348_v55, %v346_v54  ;;  %v345_v61 = vld [vmem:[%s1413_s9 + $0x140] sm:$0xff]  ;;  %v347_v62 = vld [vmem:[%s1413_s9 + $0x150] sm:$0xff] }
  0x96   : > { %817 = vmatpush1.bf16.msra.mxu1 %v816_v22  ;;  %v409_v63 = vld [vmem:[%s1413_s9 + $0x340] sm:$0xff]  ;;  %v894_v0 = vpack.c.bf16 %v412_v57, %v410_v56  ;;  %v411_v1 = vld [vmem:[%s1413_s9 + $0x350] sm:$0xff]  ;;  %v350_v2 = vld [vmem:[%s1413_s9 + $0x168] sm:$0xff]  ;;  %v832_v6 = vpack.c.bf16 %v347_v62, %v345_v61 }
  0x97   : > { %881 = vmatpush1.bf16.msra.mxu0 %v880_v23  ;;  %819 = vmatprep.subr.bf16.mxu1 %v818_v24  ;;  %v352_v3 = vld [vmem:[%s1413_s9 + $0x178] sm:$0xff]  ;;  %v414_v4 = vld [vmem:[%s1413_s9 + $0x368] sm:$0xff]  ;;  %v349_v7 = vld [vmem:[%s1413_s9 + $0x160] sm:$0xff]  ;;  %v896_v8 = vpack.c.bf16 %v411_v1, %v409_v63 }
  0x98   : > { %883 = vmatprep.subr.bf16.mxu0 %v882_v28  ;;  %v416_v5 = vld [vmem:[%s1413_s9 + $0x378] sm:$0xff]  ;;  %v834_v9 = vpack.c.bf16 %v352_v3, %v350_v2  ;;  %v351_v10 = vld [vmem:[%s1413_s9 + $0x170] sm:$0xff]  ;;  %v413_v11 = vld [vmem:[%s1413_s9 + $0x360] sm:$0xff] }
  0x99   : > { %v415_v12 = vld [vmem:[%s1413_s9 + $0x370] sm:$0xff]  ;;  %v898_v13 = vpack.c.bf16 %v416_v5, %v414_v4  ;;  %v354_v14 = vld [vmem:[%s1413_s9 + $0x188] sm:$0xff]  ;;  %v356_v15 = vld [vmem:[%s1413_s9 + $0x198] sm:$0xff]  ;;  %v836_v20 = vpack.c.bf16 %v351_v10, %v349_v7 }
  0x9a   : > { %821 = vmatpush1.bf16.msra.mxu1 %v820_v34  ;;  %v298_v16 = vld [vmem:[#allocation3 + $0x8] sm:$0xff]  ;;  %v420_v18 = vld [vmem:[%s1413_s9 + $0x398] sm:$0xff]  ;;  %v900_v21 = vpack.c.bf16 %v415_v12, %v413_v11  ;;  %v838_v22 = vpack.c.bf16 %v356_v15, %v354_v14  ;;  %v353_v23 = vld [vmem:[%s1413_s9 + $0x180] sm:$0xff] }
  0x9b   : > { %885 = vmatpush1.bf16.msra.mxu0 %v884_v35  ;;  %823 = vmatprep.subr.bf16.mxu1 %v822_v36  ;;  %v418_v17 = vld [vmem:[%s1413_s9 + $0x388] sm:$0xff]  ;;  %v300_v19 = vld [vmem:[#allocation3 + $0x18] sm:$0xff]  ;;  %v355_v24 = vld [vmem:[%s1413_s9 + $0x190] sm:$0xff] }
  0x9c   : > { %887 = vmatprep.subr.bf16.mxu0 %v886_v40  ;;  %497 = vmatprep.mubr.f32.mxu1 %v298_v16  ;;  %v417_v25 = vld [vmem:[%s1413_s9 + $0x380] sm:$0xff]  ;;  %v902_v26 = vpack.c.bf16 %v420_v18, %v418_v17  ;;  %v419_v27 = vld [vmem:[%s1413_s9 + $0x390] sm:$0xff]  ;;  %v358_v28 = vld [vmem:[%s1413_s9 + $0x1a8] sm:$0xff]  ;;  %v840_v32 = vpack.c.bf16 %v355_v24, %v353_v23 }
  0x9d   : > { %574 = vmatprep.mubr.f32.mxu0 %v300_v19  ;;  %v360_v29 = vld [vmem:[%s1413_s9 + $0x1b8] sm:$0xff]  ;;  %v422_v30 = vld [vmem:[%s1413_s9 + $0x3a8] sm:$0xff]  ;;  %v904_v33 = vpack.c.bf16 %v419_v27, %v417_v25  ;;  %v357_v35 = vld [vmem:[%s1413_s9 + $0x1a0] sm:$0xff] }
  0x9e   : > { %825 = vmatpush1.bf16.msra.mxu1 %v824_v46  ;;  %v424_v31 = vld [vmem:[%s1413_s9 + $0x3b8] sm:$0xff]  ;;  %v842_v34 = vpack.c.bf16 %v360_v29, %v358_v28  ;;  %v359_v36 = vld [vmem:[%s1413_s9 + $0x1b0] sm:$0xff]  ;;  %v421_v37 = vld [vmem:[%s1413_s9 + $0x3a0] sm:$0xff] }
  0x9f   : > { %889 = vmatpush1.bf16.msra.mxu0 %v888_v47  ;;  %827 = vmatprep.subr.bf16.mxu1 %v826_v48  ;;  %v906_v38 = vpack.c.bf16 %v424_v31, %v422_v30  ;;  %v423_v39 = vld [vmem:[%s1413_s9 + $0x3b0] sm:$0xff]  ;;  %v362_v40 = vld [vmem:[%s1413_s9 + $0x1c8] sm:$0xff]  ;;  %v364_v41 = vld [vmem:[%s1413_s9 + $0x1d8] sm:$0xff]  ;;  %v844_v44 = vpack.c.bf16 %v359_v36, %v357_v35 }
  0xa0   : > { %891 = vmatprep.subr.bf16.mxu0 %v890_v52  ;;  %v426_v42 = vld [vmem:[%s1413_s9 + $0x3c8] sm:$0xff]  ;;  %v428_v43 = vld [vmem:[%s1413_s9 + $0x3d8] sm:$0xff]  ;;  %v908_v45 = vpack.c.bf16 %v423_v39, %v421_v37  ;;  %v846_v46 = vpack.c.bf16 %v364_v41, %v362_v40  ;;  %v361_v47 = vld [vmem:[%s1413_s9 + $0x1c0] sm:$0xff] }
  0xa1   : > { %v363_v48 = vld [vmem:[%s1413_s9 + $0x1d0] sm:$0xff]  ;;  %v425_v49 = vld [vmem:[%s1413_s9 + $0x3c0] sm:$0xff]  ;;  %v910_v50 = vpack.c.bf16 %v428_v43, %v426_v42  ;;  %v366_v52 = vld [vmem:[%s1413_s9 + $0x1e8] sm:$0xff] }
  0xa2   : > { %829 = vmatpush1.bf16.msra.mxu1 %v828_v58  ;;  %v427_v51 = vld [vmem:[%s1413_s9 + $0x3d0] sm:$0xff]  ;;  %v368_v53 = vld [vmem:[%s1413_s9 + $0x1f8] sm:$0xff]  ;;  %v430_v54 = vld [vmem:[%s1413_s9 + $0x3e8] sm:$0xff]  ;;  %v848_v56 = vpack.c.bf16 %v363_v48, %v361_v47 }
  0xa3   : > { %893 = vmatpush1.bf16.msra.mxu0 %v892_v59  ;;  %831 = vmatprep.subr.bf16.mxu1 %v830_v60  ;;  %v432_v55 = vld [vmem:[%s1413_s9 + $0x3f8] sm:$0xff]  ;;  %v912_v57 = vpack.c.bf16 %v427_v51, %v425_v49  ;;  %v850_v58 = vpack.c.bf16 %v368_v53, %v366_v52  ;;  %v365_v59 = vld [vmem:[%s1413_s9 + $0x1e0] sm:$0xff]  ;;  %v367_v60 = vld [vmem:[%s1413_s9 + $0x1f0] sm:$0xff] }
  0xa4   : > { %895 = vmatprep.subr.bf16.mxu0 %v894_v0  ;;  %v914_v61 = vpack.c.bf16 %v432_v55, %v430_v54  ;;  %v429_v62 = vld [vmem:[%s1413_s9 + $0x3e0] sm:$0xff]  ;;  %v431_v63 = vld [vmem:[%s1413_s9 + $0x3f0] sm:$0xff]  ;;  %v852_v0 = vpack.c.bf16 %v367_v60, %v365_v59  ;;  %v302_v4 = vld [vmem:[#allocation3 + $0x28] sm:$0xff] }
  0xa5   : > { %v916_v1 = vpack.c.bf16 %v431_v63, %v429_v62  ;;  %v297_v2 = vld [vmem:[#allocation3] sm:$0xff]  ;;  %v299_v3 = vld [vmem:[#allocation3 + $0x10] sm:$0xff]  ;;  %v304_v5 = vld [vmem:[#allocation3 + $0x38] sm:$0xff] }
  0xa6   : > { %833 = vmatpush1.bf16.msra.mxu1 %v832_v6  ;;  %v301_v6 = vld [vmem:[#allocation3 + $0x20] sm:$0xff]  ;;  %v303_v7 = vld [vmem:[#allocation3 + $0x30] sm:$0xff] }
  0xa7   : > { %897 = vmatpush1.bf16.msra.mxu0 %v896_v8  ;;  %835 = vmatprep.subr.bf16.mxu1 %v834_v9  ;;  %v604_v8 = vlaneseq  ;;  %v602_v11 = vld [vmem:[%s250_s30] sm:$0x3] }
  0xa8   : > { %899 = vmatprep.subr.bf16.mxu0 %v898_v13 }
  0xa9   : > { %v605_v9 = vshrl.u32 %v604_v8, 7 }
  0xaa   : > { %837 = vmatpush1.bf16.msra.mxu1 %v836_v20 }
  0xab   : > { %901 = vmatpush1.bf16.msra.mxu0 %v900_v21  ;;  %839 = vmatprep.subr.bf16.mxu1 %v838_v22  ;;  %v606_v10 = vsub.s32 0, %v605_v9  ;;  %v610_v12 = vsub.s32 1, %v605_v9 }
  0xac   : > { %903 = vmatprep.subr.bf16.mxu0 %v902_v26 }
  0xad   : > { %v607_v14 = vrot.slane %v602_v11, %v606_v10  ;;  %v611_v17 = vrot.slane %v602_v11, %v610_v12 }
  0xae   : > { %841 = vmatpush1.bf16.msra.mxu1 %v840_v32 }
  0xaf   : > { %905 = vmatpush1.bf16.msra.mxu0 %v904_v33  ;;  %843 = vmatprep.subr.bf16.mxu1 %v842_v34 }
  0xb0   : > { %907 = vmatprep.subr.bf16.mxu0 %v906_v38 }
  0xb2   : > { %845 = vmatpush1.bf16.msra.mxu1 %v844_v44 }
  0xb3   : > { %909 = vmatpush1.bf16.msra.mxu0 %v908_v45  ;;  %847 = vmatprep.subr.bf16.mxu1 %v846_v46 }
  0xb4   : > { %911 = vmatprep.subr.bf16.mxu0 %v910_v50 }
  0xb6   : > { %849 = vmatpush1.bf16.msra.mxu1 %v848_v56 }
  0xb7   : > { %913 = vmatpush1.bf16.msra.mxu0 %v912_v57  ;;  %851 = vmatprep.subr.bf16.mxu1 %v850_v58 }
  0xb8   : > { %915 = vmatprep.subr.bf16.mxu0 %v914_v61 }
  0xba   : > { %853 = vmatpush1.bf16.msra.mxu1 %v852_v0 }
  0xbb   : > { %917 = vmatpush1.bf16.msra.mxu0 %v916_v1 }
  0xbd   : > { %498 = vmatmul.mubr.f32.vlgmr.msra.gmra.mrb[0].mxu1 %v297_v2 }
  0xbe   : > { %575 = vmatmul.mubr.f32.vlgmr.msra.gmra.mrb[0].mxu0 %v299_v3  ;;  %503 = vmatprep.mubr.f32.mxu1 %v302_v4 }
  0xbf   : > { %580 = vmatprep.mubr.f32.mxu0 %v304_v5 }
  0xc1   : > { %504 = vmatmul.mubr.f32.gmra.mrb[2].mxu1 %v301_v6 }
  0xc2   : > { %581 = vmatmul.mubr.f32.gmra.mrb[2].mxu0 %v303_v7 }
 0x190   : > { %v499_v13 = vpop.f32.mrb[0].mxu1 }
 0x191   : > { %v576_v15 = vpop.f32.mrb[0].mxu0  ;;  %v501_v16 = vpop.f32.mrb[1].mxu1 }
 0x192   : > { %v577_v18 = vadd.f32 %v576_v15, %v499_v13  ;;  %v578_v19 = vpop.f32.mrb[1].mxu0 }
 0x193   : > { %v579_v20 = vadd.f32 %v578_v19, %v501_v16 }
 0x194   : > { %v614_v21 = vadd.f32 %v607_v14, %v577_v18  ;;  %v505_v22 = vpop.f32.mrb[2].mxu1 }
 0x195   : > { %v615_v23 = vadd.f32 %v611_v17, %v579_v20  ;;  %v582_v24 = vpop.f32.mrb[2].mxu0  ;;  %v507_v25 = vpop.f32.mrb[3].mxu1 }
 0x196   : > { %618 = vst [vmem:[%s277_s8] sm:$0xff] %v614_v21  ;;  %v583_v26 = vadd.f32 %v582_v24, %v505_v22  ;;  %v584_v27 = vpop.f32.mrb[3].mxu0 }
 0x197   : > { %619 = vst [vmem:[%s277_s8 + $0x8] sm:$0xff] %v615_v23  ;;  %v585_v28 = vadd.f32 %v584_v27, %v507_v25 }
 0x198   : > { %v616_v29 = vadd.f32 %v607_v14, %v583_v26 }
 0x199   : > { %v617_v30 = vadd.f32 %v611_v17, %v585_v28 }
 0x19a   : > { %620 = vst [vmem:[%s277_s8 + $0x10] sm:$0xff] %v616_v29 }
 0x19b   : > { %621 = vst [vmem:[%s277_s8 + $0x18] sm:$0xff] %v617_v30 }
 0x19c   : > { %1109 = shalt.err (!%p1106_p7)
}
 0x19d   : > { %s1110_s18 = scalar_lea.hbm %s1555_s23, 512  ;;  %s1114_s6 = scalar_lea.hbm %s1606_s3, 3072 }
 0x19e   : > { %p1111_p9 = scmp.ne.s32.totalorder %s1555_s23, %s1110_s18  ;;  %p1115_p10 = scmp.lt.u32.totalorder %s1555_s23, %s1606_s3 }
 0x19f   : > { %p1116_p2 = scmp.lt.u32.totalorder %s1114_s6, %s1110_s18  ;;  %p1118_p3 = scmp.lt.u32.totalorder %s1110_s18, %s1555_s23 }
 0x1a0   : > { %p1112_p12 = pnand %p1111_p9, %p1631_p5 }
 0x1a1   : > { %p1117_p0 = por %p1116_p2, %p1115_p10 }
 0x1a2   : > { %p1113_p6 = pneg %p1112_p12 }
 0x1a3   : > { %p1119_p1 = por %p1118_p3, %p1117_p0 }
 0x1a5   : > { %p1120_p11 = pnand %p1119_p1, %p1113_p6 }
 0x1a7   : > { %1123 = shalt.err (!%p1120_p11)
}
 0x1a8   : > { %s1193_s30 = smov 256   ;;  %s1194_s7 = smov 1536  }
 0x1a9   : > { %s1195_s8 = smov 16  }
 0x1aa   : > { %930 = dma.vmem_to_hbm [thread:$0]  (%p1631_p5), %s1550_s25, 512, %s1555_s23, %s623_s15, %s1193_s30, %s1194_s7, %s1195_s8  }
 0x1ab PF: > { %p950_p13 = scmp.ge.s32.totalorder %s1182_s17, 2  ;;  %s654_s27 = sand.u32 1, %s1162_s12  }
 0x1ac   : > { %p1632_p8 = scmp.ne.s32.totalorder %s1621_s4, 0  ;;  %s655_s22 = scalar_lea.sflag [#allocation5], %s654_s27 }
 0x1ae   : > { %p944_p4 = pnand %p950_p13, %p1632_p8 }
 0x1b0   : > { %1157 = dma.done.wait (!%p944_p4), %s655_s22, 512  }
 0x1b1   : > { %1159 = vsyncadd (!%p944_p4), %s655_s22, 4294966784  ;;  %s20_s17 = sadd.s32 1, %s1182_s17   ;;  %s1633_s28 = sld [smem:[#allocation13_spill]] }
 0x1b2   : > { %p17_p7 = scmp.ge.s32.totalorder %s20_s17, 8   ;;  %s1634_s12 = smov %s1166_s13 }
 0x1b3   : > { %s1635_s13 = smov %s1170_s14  ;;  %s1636_s14 = smov %s1263_s24 }
 0x1b4   : > { %s1637_s15 = smov %s1178_s16  ;;  %19 = sbr.rel (!%p17_p7) target bundleno = 9 (0x9), region = 102 }
 0x1b7   : > { %s1638_s16 = smov %s1633_s28 }
 0x1bb   :  { %660 = vsyncpa [#allocation4], 1 }
 0x1bc   :  { %662 = vsyncpa [#allocation4 + $0x1], 1 }
 0x1bd   :  { %663 = vsyncpa [#allocation7], 1 }
 0x1be   :  { %665 = vsyncpa [#allocation7 + $0x1], 1 }
 0x1bf   :  { %666 = vsyncpa [#allocation5], 1 }
 0x1c0   :  { %668 = vsyncpa [#allocation5 + $0x1], 1 }

</bundles_post_ra>
